<compile_context>
chip_gen: v7x
topology: tpu7x:2x2x1
jax: 0.10.0
libtpu: 0.0.40
codegen_flags: <defaults>
</compile_context>

<pallas_src>
import jax
import jax.numpy as jnp
from jax.experimental import pallas as pl
from jax.experimental.pallas import tpu as pltpu

_LANE = 128
# pad the flat buffer to a multiple of 32*128 elements so the (rows, 128)
# slab tiles cleanly for any dtype down to int8 (sublane packing).
_MIN_CHUNK = 32 * _LANE
_TARGET_BLOCK_ROWS = 1024  # 1024 x 128 f32 = 512 KiB per block


def _binact_kernel(slope_ref, x_ref, y_ref, ybin_ref):
    # slope is a scalar held in SMEM; compute in f32 in-register
    # (v5e has no bf16 VPU/EUP path), store in the output dtype.
    slope = slope_ref[0].astype(jnp.float32)
    x = x_ref[...].astype(jnp.float32)
    z = jax.nn.sigmoid(slope * x)
    y_ref[...] = z.astype(y_ref.dtype)
    ybin_ref[...] = jnp.round(z).astype(ybin_ref.dtype)


def deterministic_binary_activation(x, slope, *, block_rows=_TARGET_BLOCK_ROWS):
    """x: any-shaped float array (e.g. NCHW). slope: python/scalar float.

    Returns (sigmoid(slope*x), round(sigmoid(slope*x))), both in x.dtype.
    """
    orig_shape = x.shape
    orig_dtype = x.dtype
    n = x.size

    xf = jnp.ravel(x)
    rem = n % _MIN_CHUNK
    if rem:  # pad only when needed (avoid an extra HBM pass otherwise)
        xf = jnp.pad(xf, (0, _MIN_CHUNK - rem))
    rows = xf.size // _LANE
    x2 = xf.reshape(rows, _LANE)  # rows % 32 == 0

    # Big lane-dense blocks; cap at the actual row count for small inputs.
    br = min(block_rows, rows)
    grid = (pl.cdiv(rows, br),)

    slope_arr = jnp.asarray(slope, dtype=jnp.float32).reshape((1,))

    y2, ybin2 = pl.pallas_call(
        _binact_kernel,
        out_shape=(
            jax.ShapeDtypeStruct((rows, _LANE), orig_dtype),
            jax.ShapeDtypeStruct((rows, _LANE), orig_dtype),
        ),
        grid=grid,
        in_specs=[
            pl.BlockSpec(memory_space=pltpu.SMEM),          # slope scalar
            pl.BlockSpec((br, _LANE), lambda i: (i, 0)),    # x block
        ],
        out_specs=(
            pl.BlockSpec((br, _LANE), lambda i: (i, 0)),
            pl.BlockSpec((br, _LANE), lambda i: (i, 0)),
        ),
        compiler_params=pltpu.CompilerParams(
            dimension_semantics=("parallel",)),
    )(slope_arr, x2)

    y = y2.reshape(-1)[:n].reshape(orig_shape)
    ybin = ybin2.reshape(-1)[:n].reshape(orig_shape)
    return y, ybin


if __name__ == "__main__":
    key = jax.random.PRNGKey(0)
    # NCHW-style input, small shapes (batch=2, channels=4, spatial=16)
    x = jax.random.normal(key, (2, 4, 16, 16), dtype=jnp.float32)
    slope = 5.0  # the "slope" element of the (x, slope) input tuple

    y, y_bin = deterministic_binary_activation(x, slope)
    jax.block_until_ready((y, y_bin))

    # reference check in plain JAX
    y_ref = jax.nn.sigmoid(slope * x)
    ybin_ref = jnp.round(y_ref)
    assert y.shape == x.shape and y_bin.shape == x.shape
    assert y.dtype == x.dtype and y_bin.dtype == x.dtype
    assert jnp.allclose(y, y_ref, atol=1e-6), "sigmoid branch mismatch"
    assert jnp.allclose(y_bin, ybin_ref), "binarized branch mismatch"

    print("KERNEL_OK")
</pallas_src>

<mosaic_0001>
module attributes {stable_mosaic.version = 11 : i64} {
  func.func @_binact_kernel(%arg0: i32, %arg1: memref<1xf32, #tpu.memory_space<smem>>, %arg2: memref<32x128xf32, #tpu.memory_space<vmem>>, %arg3: memref<32x128xf32, #tpu.memory_space<vmem>>, %arg4: memref<32x128xf32, #tpu.memory_space<vmem>>) attributes {dimension_semantics = [#tpu.dimension_semantics<parallel>], iteration_bounds = array<i64: 1>, scalar_prefetch = 0 : i64, scratch_operands = 0 : i64, tpu.core_type = #tpu.core_type<tc>, window_params = [{transform_indices = @transform_0, window_bounds = array<i64: 1>}, {transform_indices = @transform_1, window_bounds = array<i64: 32, 128>}, {transform_indices = @transform_2, window_bounds = array<i64: 32, 128>}, {transform_indices = @transform_3, window_bounds = array<i64: 32, 128>}]} {
    %c0 = arith.constant 0 : index
    %0 = memref.load %arg1[%c0] : memref<1xf32, #tpu.memory_space<smem>>
    %c0_0 = arith.constant 0 : index
    %c0_1 = arith.constant 0 : index
    %1 = vector.load %arg2[%c0_0, %c0_1] : memref<32x128xf32, #tpu.memory_space<vmem>>, vector<32x128xf32>
    %2 = vector.broadcast %0 : f32 to vector<32x128xf32>
    %3 = arith.mulf %2, %1 : vector<32x128xf32>
    %4 = arith.negf %3 : vector<32x128xf32>
    %5 = math.exp %4 : vector<32x128xf32>
    %cst = arith.constant 1.000000e+00 : f32
    %6 = vector.broadcast %cst : f32 to vector<32x128xf32>
    %7 = arith.addf %6, %5 : vector<32x128xf32>
    %8 = arith.divf %6, %7 : vector<32x128xf32>
    %c0_2 = arith.constant 0 : index
    %c0_3 = arith.constant 0 : index
    %9 = vector.load %arg3[%c0_2, %c0_3] : memref<32x128xf32, #tpu.memory_space<vmem>>, vector<32x128xf32>
    tpu.vector_store %arg3[%c0_2, %c0_3], %8 {strides = array<i32>} : memref<32x128xf32, #tpu.memory_space<vmem>>, vector<32x128xf32>,
    %10 = math.roundeven %8 : vector<32x128xf32>
    %c0_4 = arith.constant 0 : index
    %c0_5 = arith.constant 0 : index
    %11 = vector.load %arg4[%c0_4, %c0_5] : memref<32x128xf32, #tpu.memory_space<vmem>>, vector<32x128xf32>
    tpu.vector_store %arg4[%c0_4, %c0_5], %10 {strides = array<i32>} : memref<32x128xf32, #tpu.memory_space<vmem>>, vector<32x128xf32>,
    return
  }
  func.func @transform_0(%arg0: i32) -> i32 {
    %c0_i32 = arith.constant 0 : i32
    %c0_i32_0 = arith.constant 0 : i32
    return %c0_i32 : i32
  }
  func.func @transform_1(%arg0: i32) -> (i32, i32) {
    %c0_i32 = arith.constant 0 : i32
    %c0_i32_0 = arith.constant 0 : i32
    return %arg0, %c0_i32 : i32, i32
  }
  func.func @transform_2(%arg0: i32) -> (i32, i32) {
    %c0_i32 = arith.constant 0 : i32
    %c0_i32_0 = arith.constant 0 : i32
    return %arg0, %c0_i32 : i32, i32
  }
  func.func @transform_3(%arg0: i32) -> (i32, i32) {
    %c0_i32 = arith.constant 0 : i32
    %c0_i32_0 = arith.constant 0 : i32
    return %arg0, %c0_i32 : i32, i32
  }
}

</mosaic_0001>

<bundles_post_ra>
// kernel: tpu_custom_call.1
= control target key start
LH: loop header
LB: loop body
LE: loop exit
PB: predicated region body
PF: predicated region fallthrough
CT: control target
= control target key end

     0   :  { %10 = vsyncpa [#allocation4], 0  ;;  %s290_s0 = inlined_call_operand.<no memory space> [shape: f32[1], index: 0, kind: input, shape index: {}]   ;;  %s291_s1 = inlined_call_operand.hbm [shape: f32[32,128], index: 1, kind: input, shape index: {}]   ;;  %s292_s2 = inlined_call_operand.hbm [shape: f32[32,128], index: 2, kind: output, shape index: {0}]   ;;  %s293_s3 = inlined_call_operand.hbm [shape: f32[32,128], index: 3, kind: output, shape index: {1}]  }
   0x1   :  { %11 = vsyncpa [#allocation5], 0 }
   0x2   :  { %12 = vsyncpa [#allocation8], 0  ;;  %s210_s12 = smov [#allocation3]   ;;  %s138_s16 = scalar_lea.hbm %s291_s1, 512 }
   0x3   :  { %s20_s13 = sshll.u32 %s210_s12, 4  ;;  %p139_p0 = scmp.ne.s32.totalorder %s291_s1, %s138_s16  ;;  %s21_s13 = int_to_ptr.vmem [resolvable:$true] %s20_s13 }
   0x4   :  { %p142_p1 = scmp.lt.u32.totalorder %s138_s16, %s291_s1 }
   0x6   :  { %p144_p2 = pnand %p142_p1, %p139_p0 }
   0x8   :  { %147 = shalt.err (!%p144_p2)
}
   0x9   :  { %s148_s21 = scalar_lea.vmem %s21_s13, 512  ;;  %p153_p4 = scmp.lt.s32.totalorder %s21_s13, %s21_s13 }
   0xa   :  { %p149_p3 = scmp.ne.s32.totalorder %s21_s13, %s148_s21  ;;  %p154_p5 = scmp.lt.s32.totalorder %s148_s21, %s148_s21 }
   0xc   :  { %p155_p6 = por %p154_p5, %p153_p4 }
   0xe   :  { %p156_p7 = pnand %p155_p6, %p149_p3 }
  0x10   :  { %159 = shalt.err (!%p156_p7)
}
  0x11   :  { %s211_s22 = smov 128   ;;  %s212_s23 = smov 8  }
  0x12   :  { %26 = dma.hbm_to_vmem [thread:$0]  %s291_s1, 512, %s21_s13, [#allocation4], %s211_s22, %s211_s22, %s212_s23  }
  0x13   :  { %204 = dma.done.wait [#allocation4], 512  }
  0x14   :  { %205 = vsyncadd [#allocation4], 4294966784  ;;  %v35_v0 = vstv %s290_s0  ;;  %v31_v1 = vld [vmem:[#allocation3] sm:$0xff]  ;;  %v32_v2 = vld [vmem:[#allocation3 + $0x8] sm:$0xff]  ;;  %s213_s0 = smov [#allocation6]   ;;  %s214_s28 = smov [#allocation7]  }
  0x15   :  { %v33_v3 = vld [vmem:[#allocation3 + $0x10] sm:$0xff]  ;;  %v36_v4 = vmul.f32 %v35_v0, %v31_v1  ;;  %v37_v5 = vmul.f32 %v35_v0, %v32_v2  ;;  %v34_v7 = vld [vmem:[#allocation3 + $0x18] sm:$0xff]  ;;  %s81_s1 = sshll.u32 %s213_s0, 4  ;;  %s93_s29 = sshll.u32 %s214_s28, 4  ;;  %s82_s1 = int_to_ptr.vmem [resolvable:$true] %s81_s1  ;;  %s253_s29 = int_to_ptr.vmem [resolvable:$true] %s93_s29 }
  0x16   :  { %v38_v6 = vmul.f32 %v35_v0, %v33_v3  ;;  %v39_v8 = vmul.f32 %v35_v0, %v34_v7  ;;  %s160_s30 = scalar_lea.vmem %s82_s1, 512  ;;  %p165_p9 = scmp.lt.s32.totalorder %s82_s1, %s82_s1 }
  0x17   :  { %v109_v9 = vmul.f32 -1.442695, %v36_v4  ;;  %v110_v10 = vmul.f32 -1.442695, %v37_v5  ;;  %p161_p8 = scmp.ne.s32.totalorder %s82_s1, %s160_s30  ;;  %p166_p10 = scmp.lt.s32.totalorder %s160_s30, %s160_s30 }
  0x18   :  { %v111_v11 = vmul.f32 -1.442695, %v38_v6  ;;  %v112_v12 = vmul.f32 -1.442695, %v39_v8 }
  0x19   :  { %122 = vpow2.f32 %v109_v9  ;;  %p167_p11 = por %p166_p10, %p165_p9 }
  0x1a   :  { %124 = vpow2.f32 %v110_v10 }
  0x1b   :  { %126 = vpow2.f32 %v111_v11  ;;  %p168_p12 = pnand %p167_p11, %p161_p8 }
  0x1c   :  { %128 = vpow2.f32 %v112_v12 }
  0x23   :  { %v123_v13 = vpop.eup %122 }
  0x24   :  { %v125_v14 = vpop.eup %124  ;;  %v52_v15 = vadd.f32 1.0, %v123_v13 }
  0x25   :  { %v127_v16 = vpop.eup %126  ;;  %v53_v17 = vadd.f32 1.0, %v125_v14 }
  0x26   :  { %v129_v18 = vpop.eup %128  ;;  %130 = vrcp.f32 %v52_v15  ;;  %v54_v19 = vadd.f32 1.0, %v127_v16 }
  0x27   :  { %132 = vrcp.f32 %v53_v17  ;;  %v55_v20 = vadd.f32 1.0, %v129_v18 }
  0x28   :  { %134 = vrcp.f32 %v54_v19 }
  0x29   :  { %136 = vrcp.f32 %v55_v20 }
  0x30   :  { %v131_v21 = vpop.eup %130 }
  0x31   :  { %v133_v22 = vpop.eup %132  ;;  %64 = vst [vmem:[#allocation6] sm:$0xff] %v131_v21  ;;  %v113_v23 = vround.rtne.f32 %v131_v21 }
  0x32   :  { %v135_v24 = vpop.eup %134  ;;  %65 = vst [vmem:[#allocation6 + $0x8] sm:$0xff] %v133_v22  ;;  %v114_v25 = vround.rtne.f32 %v133_v22 }
  0x33   :  { %v137_v26 = vpop.eup %136  ;;  %66 = vst [vmem:[#allocation6 + $0x10] sm:$0xff] %v135_v24  ;;  %72 = vst [vmem:[#allocation7] sm:$0xff] %v113_v23  ;;  %v115_v27 = vround.rtne.f32 %v135_v24 }
  0x34   :  { %67 = vst [vmem:[#allocation6 + $0x18] sm:$0xff] %v137_v26  ;;  %73 = vst [vmem:[#allocation7 + $0x8] sm:$0xff] %v114_v25  ;;  %v116_v28 = vround.rtne.f32 %v137_v26 }
  0x35   :  { %74 = vst [vmem:[#allocation7 + $0x10] sm:$0xff] %v115_v27 }
  0x36   :  { %171 = shalt.err (!%p168_p12)
}
  0x37   :  { %s172_s6 = scalar_lea.hbm %s292_s2, 512 }
  0x38   :  { %p173_p13 = scmp.ne.s32.totalorder %s292_s2, %s172_s6  ;;  %p176_p0 = scmp.lt.u32.totalorder %s172_s6, %s292_s2 }
  0x3a   :  { %p178_p1 = pnand %p176_p0, %p173_p13 }
  0x3c   :  { %181 = shalt.err (!%p178_p1)
}
  0x3d   :  { %87 = dma.vmem_to_hbm [thread:$0]  %s82_s1, 512, %s292_s2, [#allocation5], %s211_s22, %s211_s22, %s212_s23   ;;  %75 = vst [vmem:[#allocation7 + $0x18] sm:$0xff] %v116_v28 }
  0x3e   :  { %s182_s13 = scalar_lea.vmem %s253_s29, 512  ;;  %p187_p3 = scmp.lt.s32.totalorder %s253_s29, %s253_s29 }
  0x3f   :  { %p183_p2 = scmp.ne.s32.totalorder %s253_s29, %s182_s13  ;;  %p188_p4 = scmp.lt.s32.totalorder %s182_s13, %s182_s13 }
  0x41   :  { %p189_p5 = por %p188_p4, %p187_p3 }
  0x43   :  { %p190_p6 = pnand %p189_p5, %p183_p2 }
  0x45   :  { %193 = shalt.err (!%p190_p6)
}
  0x46   :  { %s194_s16 = scalar_lea.hbm %s293_s3, 512 }
  0x47   :  { %p195_p7 = scmp.ne.s32.totalorder %s293_s3, %s194_s16  ;;  %p198_p8 = scmp.lt.u32.totalorder %s194_s16, %s293_s3 }
  0x49   :  { %p200_p9 = pnand %p198_p8, %p195_p7 }
  0x4b   :  { %203 = shalt.err (!%p200_p9)
}
  0x4c   :  { %99 = dma.vmem_to_hbm [thread:$0]  %s253_s29, 512, %s293_s3, [#allocation8], %s211_s22, %s211_s22, %s212_s23  }
  0x4d   :  { %206 = dma.done.wait [#allocation5], 512  }
  0x4e   :  { %207 = vsyncadd [#allocation5], 4294966784 }
  0x4f   :  { %208 = dma.done.wait [#allocation8], 512  }
  0x50   :  { %209 = vsyncadd [#allocation8], 4294966784 }
  0x51   :  { %106 = vsyncpa [#allocation4], 1 }
  0x52   :  { %107 = vsyncpa [#allocation5], 1 }
  0x53   :  { %108 = vsyncpa [#allocation8], 1 }

</bundles_post_ra>
